<compile_context>
chip_gen: v7x
topology: tpu7x:2x2x1
jax: 0.10.0
libtpu: 0.0.40
codegen_flags: <defaults>
</compile_context>

<pallas_src>
import jax
import jax.numpy as jnp
from jax.experimental import pallas as pl
from jax.experimental.pallas import tpu as pltpu

N_EMBD = 128
HIDDEN = 4 * N_EMBD  # 512


# ---------------- fused MLP kernel -------------------------------------------
def feedforward_kernel(x_ref, w1_ref, b1_ref, w2_ref, b2_ref, out_ref):
    # x_ref: (tm, C)         w1_ref: (C, H) bf16   b1_ref: (1, H) f32
    # w2_ref: (H, C) bf16    b2_ref: (1, C) f32    out_ref: (tm, C)
    x = x_ref[...].astype(jnp.bfloat16)

    # Linear 1 (bf16 operands, f32 accumulation on the MXU) + bias + ReLU.
    h = jnp.dot(x, w1_ref[...], preferred_element_type=jnp.float32) + b1_ref[...]
    # Cast the hidden tile to bf16 exactly once (halves the largest in-kernel
    # buffer vs. casting inside the second dot call).
    h = jnp.maximum(h, 0.0).astype(jnp.bfloat16)

    # Linear 2.
    y = jnp.dot(h, w2_ref[...], preferred_element_type=jnp.float32) + b2_ref[...]

    out_ref[...] = y.astype(out_ref.dtype)


# ---------------- tiling helpers ----------------------------------------------
def _round_up(x, m):
    return (x + m - 1) // m * m


def _choose_row_tile(m, cap=1024):
    """Largest MXU-friendly row tile (multiple of 128, <= cap) that still gives
    >= 2 grid steps when there are enough rows (v7x megacore sharding)."""
    if m <= 128:
        return 128
    if m < 256:
        return _round_up(m, 128)
    tm = min(cap, (m // 2) // 128 * 128)  # >= 2 grid steps
    return max(tm, 128)


# ---------------- wrapper ------------------------------------------------------
def feedforward(x, w1, b1, w2, b2, *, tm_cap=1024):
    """x: (..., C). Returns same shape/dtype. w1: (C, H), w2: (H, C)."""
    orig_shape = x.shape
    C = orig_shape[-1]
    H = w1.shape[1]
    assert C % 128 == 0 and H % 128 == 0, "feature dims must be lane-aligned"

    x2d = x.reshape(-1, C)
    M = x2d.shape[0]

    tm = _choose_row_tile(M, tm_cap)
    Mp = _round_up(M, tm)
    if Mp != M:
        # Pad rows instead of degenerating to one giant block (VMEM-safe).
        x2d = jnp.pad(x2d, ((0, Mp - M), (0, 0)))
    grid = (Mp // tm,)

    # Cast weights once in the wrapper (halves weight DMA bytes, MXU bf16-native).
    w1b = w1.astype(jnp.bfloat16)
    w2b = w2.astype(jnp.bfloat16)
    b1r = b1.reshape(1, H).astype(jnp.float32)
    b2r = b2.reshape(1, C).astype(jnp.float32)

    out_dtype = x.dtype
    act_bytes = x2d.dtype.itemsize
    out_bytes = jnp.dtype(out_dtype).itemsize
    cost = pl.CostEstimate(
        flops=4 * Mp * C * H,                       # two matmuls: 2*M*C*H each
        transcendentals=0,
        bytes_accessed=int(Mp * C * (act_bytes + out_bytes)
                           + (C * H + H * C) * 2    # bf16 weights
                           + (H + C) * 4),          # f32 biases
    )

    out2d = pl.pallas_call(
        feedforward_kernel,
        out_shape=jax.ShapeDtypeStruct((Mp, C), out_dtype),
        grid=grid,
        in_specs=[
            pl.BlockSpec((tm, C), lambda i: (i, 0)),   # x row tile
            pl.BlockSpec((C, H), lambda i: (0, 0)),    # W1 (grid-invariant)
            pl.BlockSpec((1, H), lambda i: (0, 0)),    # b1
            pl.BlockSpec((H, C), lambda i: (0, 0)),    # W2 (grid-invariant)
            pl.BlockSpec((1, C), lambda i: (0, 0)),    # b2
        ],
        out_specs=pl.BlockSpec((tm, C), lambda i: (i, 0)),
        compiler_params=pltpu.CompilerParams(
            dimension_semantics=("parallel",),         # shard row tiles on v7x
            vmem_limit_bytes=32 * 1024 * 1024,         # lifts v5e's 16 MiB default
        ),
        cost_estimate=cost,
    )(x2d, w1b, b1r, w2b, b2r)

    if Mp != M:
        out2d = out2d[:M]
    return out2d.reshape(orig_shape)


# ---------------- plain-JAX reference (f32) ----------------------------------
def feedforward_ref(x, w1, b1, w2, b2):
    h = jnp.maximum(x @ w1 + b1, 0.0)
    return h @ w2 + b2


if __name__ == "__main__":
    key = jax.random.PRNGKey(0)
    kx, k1, k2, kx2 = jax.random.split(key, 4)

    B, T, C, H = 2, 64, N_EMBD, HIDDEN

    x = jax.random.normal(kx, (B, T, C), dtype=jnp.float32)
    # (in, out) layout; scale ~ 1/sqrt(fan_in) like torch's default init range.
    w1 = jax.random.normal(k1, (C, H), dtype=jnp.float32) * (C ** -0.5)
    b1 = jnp.zeros((H,), jnp.float32)
    w2 = jax.random.normal(k2, (H, C), dtype=jnp.float32) * (H ** -0.5)
    b2 = jnp.zeros((C,), jnp.float32)

    ff = jax.jit(feedforward)

    # Small shape matching the module's typical use (M = 128, single tile).
    y = ff(x, w1, b1, w2, b2)
    jax.block_until_ready(y)
    assert y.shape == (B, T, C)
    assert y.dtype == jnp.float32
    assert bool(jnp.all(jnp.isfinite(y)))
    y_ref = feedforward_ref(x, w1, b1, w2, b2)
    err = jnp.max(jnp.abs(y - y_ref))
    assert bool(err < 3e-2), f"max abs error {err}"

    # Second check: non-multiple-of-128 row count -> exercises padding +
    # multi-step ("parallel") grid.
    x2 = jax.random.normal(kx2, (4, 200, C), dtype=jnp.float32)
    y2 = ff(x2, w1, b1, w2, b2)
    jax.block_until_ready(y2)
    assert y2.shape == (4, 200, C)
    y2_ref = feedforward_ref(x2, w1, b1, w2, b2)
    err2 = jnp.max(jnp.abs(y2 - y2_ref))
    assert bool(err2 < 3e-2), f"max abs error {err2}"

    print("KERNEL_OK")
</pallas_src>

<mosaic_0001>
module attributes {stable_mosaic.version = 11 : i64} {
  func.func @feedforward_kernel(%arg0: i32, %arg1: memref<128x128xf32, #tpu.memory_space<vmem>>, %arg2: memref<128x512xbf16, #tpu.memory_space<vmem>>, %arg3: memref<1x512xf32, #tpu.memory_space<vmem>>, %arg4: memref<512x128xbf16, #tpu.memory_space<vmem>>, %arg5: memref<1x128xf32, #tpu.memory_space<vmem>>, %arg6: memref<128x128xf32, #tpu.memory_space<vmem>>) attributes {dimension_semantics = [#tpu.dimension_semantics<parallel>], iteration_bounds = array<i64: 1>, scalar_prefetch = 0 : i64, scratch_operands = 0 : i64, tpu.core_type = #tpu.core_type<tc>, window_params = [{transform_indices = @transform_0, window_bounds = array<i64: 128, 128>}, {pipeline_mode = #tpu.pipeline_mode<synchronous>, transform_indices = @transform_1, window_bounds = array<i64: 128, 512>}, {pipeline_mode = #tpu.pipeline_mode<synchronous>, transform_indices = @transform_2, window_bounds = array<i64: 1, 512>}, {pipeline_mode = #tpu.pipeline_mode<synchronous>, transform_indices = @transform_3, window_bounds = array<i64: 512, 128>}, {pipeline_mode = #tpu.pipeline_mode<synchronous>, transform_indices = @transform_4, window_bounds = array<i64: 1, 128>}, {transform_indices = @transform_5, window_bounds = array<i64: 128, 128>}]} {
    %c0 = arith.constant 0 : index
    %c0_0 = arith.constant 0 : index
    %0 = vector.load %arg1[%c0, %c0_0] : memref<128x128xf32, #tpu.memory_space<vmem>>, vector<128x128xf32>
    %1 = arith.truncf %0 : vector<128x128xf32> to vector<128x128xbf16>
    %c0_1 = arith.constant 0 : index
    %c0_2 = arith.constant 0 : index
    %2 = vector.load %arg2[%c0_1, %c0_2] : memref<128x512xbf16, #tpu.memory_space<vmem>>, vector<128x512xbf16>
    %cst = arith.constant dense<0.000000e+00> : vector<128x512xf32>
    %3 = tpu.matmul %1, %2, %cst {dimension_numbers = #tpu.dot_dimension_numbers<[1], [0], [0], [1], [0, 0, 1, 1], [], []>} : vector<128x128xbf16>, vector<128x512xbf16>, vector<128x512xf32> -> vector<128x512xf32>
    %c0_3 = arith.constant 0 : index
    %c0_4 = arith.constant 0 : index
    %4 = vector.load %arg3[%c0_3, %c0_4] : memref<1x512xf32, #tpu.memory_space<vmem>>, vector<1x512xf32>
    %5 = vector.broadcast %4 : vector<1x512xf32> to vector<128x512xf32>
    %6 = arith.addf %3, %5 : vector<128x512xf32>
    %cst_5 = arith.constant 0.000000e+00 : f32
    %7 = vector.broadcast %cst_5 : f32 to vector<128x512xf32>
    %8 = arith.maximumf %6, %7 : vector<128x512xf32>
    %9 = arith.truncf %8 : vector<128x512xf32> to vector<128x512xbf16>
    %c0_6 = arith.constant 0 : index
    %c0_7 = arith.constant 0 : index
    %10 = vector.load %arg4[%c0_6, %c0_7] : memref<512x128xbf16, #tpu.memory_space<vmem>>, vector<512x128xbf16>
    %cst_8 = arith.constant dense<0.000000e+00> : vector<128x128xf32>
    %11 = tpu.matmul %9, %10, %cst_8 {dimension_numbers = #tpu.dot_dimension_numbers<[1], [0], [0], [1], [0, 0, 1, 1], [], []>} : vector<128x512xbf16>, vector<512x128xbf16>, vector<128x128xf32> -> vector<128x128xf32>
    %c0_9 = arith.constant 0 : index
    %c0_10 = arith.constant 0 : index
    %12 = vector.load %arg5[%c0_9, %c0_10] : memref<1x128xf32, #tpu.memory_space<vmem>>, vector<1x128xf32>
    %13 = vector.broadcast %12 : vector<1x128xf32> to vector<128x128xf32>
    %14 = arith.addf %11, %13 : vector<128x128xf32>
    %c0_11 = arith.constant 0 : index
    %c0_12 = arith.constant 0 : index
    %15 = vector.load %arg6[%c0_11, %c0_12] : memref<128x128xf32, #tpu.memory_space<vmem>>, vector<128x128xf32>
    tpu.vector_store %arg6[%c0_11, %c0_12], %14 {strides = array<i32>} : memref<128x128xf32, #tpu.memory_space<vmem>>, vector<128x128xf32>,
    return
  }
  func.func @transform_0(%arg0: i32) -> (i32, i32) {
    %c0_i32 = arith.constant 0 : i32
    %c0_i32_0 = arith.constant 0 : i32
    return %arg0, %c0_i32 : i32, i32
  }
  func.func @transform_1(%arg0: i32) -> (i32, i32) {
    %c0_i32 = arith.constant 0 : i32
    %c0_i32_0 = arith.constant 0 : i32
    %c0_i32_1 = arith.constant 0 : i32
    return %c0_i32, %c0_i32_0 : i32, i32
  }
  func.func @transform_2(%arg0: i32) -> (i32, i32) {
    %c0_i32 = arith.constant 0 : i32
    %c0_i32_0 = arith.constant 0 : i32
    %c0_i32_1 = arith.constant 0 : i32
    return %c0_i32, %c0_i32_0 : i32, i32
  }
  func.func @transform_3(%arg0: i32) -> (i32, i32) {
    %c0_i32 = arith.constant 0 : i32
    %c0_i32_0 = arith.constant 0 : i32
    %c0_i32_1 = arith.constant 0 : i32
    return %c0_i32, %c0_i32_0 : i32, i32
  }
  func.func @transform_4(%arg0: i32) -> (i32, i32) {
    %c0_i32 = arith.constant 0 : i32
    %c0_i32_0 = arith.constant 0 : i32
    %c0_i32_1 = arith.constant 0 : i32
    return %c0_i32, %c0_i32_0 : i32, i32
  }
  func.func @transform_5(%arg0: i32) -> (i32, i32) {
    %c0_i32 = arith.constant 0 : i32
    %c0_i32_0 = arith.constant 0 : i32
    return %arg0, %c0_i32 : i32, i32
  }
}

</mosaic_0001>

<bundles_post_ra>
// kernel: feedforward.1
= control target key start
LH: loop header
LB: loop body
LE: loop exit
PB: predicated region body
PF: predicated region fallthrough
CT: control target
= control target key end

     0   :  { %v1372_v2 = vmov 0   ;;  %s1770_s0 = inlined_call_operand.vmem [shape: f32[128,128], index: 0, kind: input, shape index: {}]   ;;  %s1771_s1 = inlined_call_operand.vmem [shape: bf16[128,512], index: 1, kind: input, shape index: {}]   ;;  %s1772_s2 = inlined_call_operand.vmem [shape: f32[1,512], index: 2, kind: input, shape index: {}]   ;;  %s1773_s3 = inlined_call_operand.vmem [shape: bf16[512,128], index: 3, kind: input, shape index: {}]   ;;  %s1774_s4 = inlined_call_operand.vmem [shape: f32[1,128], index: 4, kind: input, shape index: {}]   ;;  %s1775_s5 = inlined_call_operand.hbm [shape: f32[128,128], index: 5, kind: output, shape index: {}]  }
   0x1   :  { %v1268_v0 = vld [vmem:[%s1771_s1 + $0x4] ss:$16 sps:$4 sm:$0xff]   ;;  %v1270_v1 = vld [vmem:[%s1771_s1 + $0xc] ss:$16 sps:$4 sm:$0xff]   ;;  %292 = vmatprep.mubr.bf16.mxu0 %v1372_v2  ;;  %405 = vmatprep.mubr.bf16.mxu1 %v1372_v2  ;;  %v1272_v3 = vld [vmem:[%s1771_s1] ss:$16 sps:$4 sm:$0xff]  }
   0x2   :  { %260 = vmatprep.subr.bf16.mxu0 %v1268_v0  ;;  %v1273_v4 = vld [vmem:[%s1771_s1 + $0x8] ss:$16 sps:$4 sm:$0xff]   ;;  %373 = vmatprep.subr.bf16.mxu1 %v1270_v1  ;;  %v1274_v5 = vld [vmem:[%s1771_s1 + $0x24] ss:$16 sps:$4 sm:$0xff]   ;;  %v1276_v6 = vld [vmem:[%s1771_s1 + $0x2c] ss:$16 sps:$4 sm:$0xff]  }
   0x3   :  { %261 = vmatpush1.bf16.msra.mxu0 %v1272_v3  ;;  %374 = vmatpush1.bf16.msra.mxu1 %v1273_v4  ;;  %v1278_v7 = vld [vmem:[%s1771_s1 + $0x20] ss:$16 sps:$4 sm:$0xff]   ;;  %v1279_v8 = vld [vmem:[%s1771_s1 + $0x28] ss:$16 sps:$4 sm:$0xff]   ;;  %v1280_v9 = vld [vmem:[%s1771_s1 + $0x44] ss:$16 sps:$4 sm:$0xff]  }
   0x4   :  { %262 = vmatprep.subr.bf16.mxu0 %v1274_v5  ;;  %375 = vmatprep.subr.bf16.mxu1 %v1276_v6  ;;  %v1282_v10 = vld [vmem:[%s1771_s1 + $0x4c] ss:$16 sps:$4 sm:$0xff]   ;;  %v1284_v11 = vld [vmem:[%s1771_s1 + $0x40] ss:$16 sps:$4 sm:$0xff]   ;;  %v1285_v12 = vld [vmem:[%s1771_s1 + $0x48] ss:$16 sps:$4 sm:$0xff]  }
   0x5   :  { %v1286_v13 = vld [vmem:[%s1771_s1 + $0x64] ss:$16 sps:$4 sm:$0xff]   ;;  %v1288_v14 = vld [vmem:[%s1771_s1 + $0x6c] ss:$16 sps:$4 sm:$0xff]   ;;  %v1290_v15 = vld [vmem:[%s1771_s1 + $0x60] ss:$16 sps:$4 sm:$0xff]  }
   0x6   :  { %v1291_v16 = vld [vmem:[%s1771_s1 + $0x68] ss:$16 sps:$4 sm:$0xff]   ;;  %v1292_v17 = vld [vmem:[%s1771_s1 + $0x84] ss:$16 sps:$4 sm:$0xff]   ;;  %v1294_v18 = vld [vmem:[%s1771_s1 + $0x8c] ss:$16 sps:$4 sm:$0xff]  }
   0x7   :  { %263 = vmatpush1.bf16.msra.mxu0 %v1278_v7  ;;  %376 = vmatpush1.bf16.msra.mxu1 %v1279_v8  ;;  %v1296_v19 = vld [vmem:[%s1771_s1 + $0x80] ss:$16 sps:$4 sm:$0xff]   ;;  %v1297_v20 = vld [vmem:[%s1771_s1 + $0x88] ss:$16 sps:$4 sm:$0xff]   ;;  %v1298_v21 = vld [vmem:[%s1771_s1 + $0xa4] ss:$16 sps:$4 sm:$0xff]  }
   0x8   :  { %264 = vmatprep.subr.bf16.mxu0 %v1280_v9  ;;  %377 = vmatprep.subr.bf16.mxu1 %v1282_v10  ;;  %v1300_v22 = vld [vmem:[%s1771_s1 + $0xac] ss:$16 sps:$4 sm:$0xff]   ;;  %v1302_v23 = vld [vmem:[%s1771_s1 + $0xa0] ss:$16 sps:$4 sm:$0xff]   ;;  %v1303_v24 = vld [vmem:[%s1771_s1 + $0xa8] ss:$16 sps:$4 sm:$0xff]  }
   0x9   :  { %v1304_v25 = vld [vmem:[%s1771_s1 + $0xc4] ss:$16 sps:$4 sm:$0xff]   ;;  %v1306_v26 = vld [vmem:[%s1771_s1 + $0xcc] ss:$16 sps:$4 sm:$0xff]   ;;  %v1308_v27 = vld [vmem:[%s1771_s1 + $0xc0] ss:$16 sps:$4 sm:$0xff]  }
   0xa   :  { %v1309_v28 = vld [vmem:[%s1771_s1 + $0xc8] ss:$16 sps:$4 sm:$0xff]   ;;  %v1310_v29 = vld [vmem:[%s1771_s1 + $0xe4] ss:$16 sps:$4 sm:$0xff]   ;;  %v1312_v30 = vld [vmem:[%s1771_s1 + $0xec] ss:$16 sps:$4 sm:$0xff]  }
   0xb   :  { %265 = vmatpush1.bf16.msra.mxu0 %v1284_v11  ;;  %378 = vmatpush1.bf16.msra.mxu1 %v1285_v12  ;;  %v1314_v31 = vld [vmem:[%s1771_s1 + $0xe0] ss:$16 sps:$4 sm:$0xff]   ;;  %v1315_v32 = vld [vmem:[%s1771_s1 + $0xe8] ss:$16 sps:$4 sm:$0xff]  }
   0xc   :  { %266 = vmatprep.subr.bf16.mxu0 %v1286_v13  ;;  %379 = vmatprep.subr.bf16.mxu1 %v1288_v14  ;;  %v22_v33 = vld [vmem:[%s1770_s0] sm:$0xff]  ;;  %v23_v34 = vld [vmem:[%s1770_s0 + $0x8] sm:$0xff]  ;;  %v24_v41 = vld [vmem:[%s1770_s0 + $0x10] sm:$0xff] }
   0xd   :  { %v1316_v35 = vld [vmem:[%s1773_s3 + $0x40] sm:$0xff]   ;;  %v38_v37 = vpack.c.bf16 %v23_v34, %v22_v33  ;;  %v1320_v40 = vld [vmem:[%s1773_s3 + $0x48] sm:$0xff]   ;;  %v25_v42 = vld [vmem:[%s1770_s0 + $0x18] sm:$0xff] }
   0xe   :  { %v1318_v36 = vld [vmem:[%s1773_s3 + $0xc0] sm:$0xff]   ;;  %v1322_v43 = vld [vmem:[%s1773_s3 + $0xc8] sm:$0xff]   ;;  %v1324_v46 = vld [vmem:[%s1773_s3 + $0x50] sm:$0xff]   ;;  %v39_v48 = vpack.c.bf16 %v25_v42, %v24_v41 }
   0xf   :  { %267 = vmatpush1.bf16.msra.mxu0 %v1290_v15  ;;  %380 = vmatpush1.bf16.msra.mxu1 %v1291_v16  ;;  %v1317_v38 = vld [vmem:[%s1773_s3] sm:$0xff]   ;;  %v1321_v44 = vld [vmem:[%s1773_s3 + $0x8] sm:$0xff]   ;;  %v1326_v47 = vld [vmem:[%s1773_s3 + $0xd0] sm:$0xff]  }
  0x10   :  { %268 = vmatprep.subr.bf16.mxu0 %v1292_v17  ;;  %381 = vmatprep.subr.bf16.mxu1 %v1294_v18  ;;  %v1319_v39 = vld [vmem:[%s1773_s3 + $0x80] sm:$0xff]   ;;  %v1323_v45 = vld [vmem:[%s1773_s3 + $0x88] sm:$0xff]   ;;  %v1325_v49 = vld [vmem:[%s1773_s3 + $0x10] sm:$0xff]  }
  0x11   :  { %v1327_v50 = vld [vmem:[%s1773_s3 + $0x90] sm:$0xff]   ;;  %v1328_v51 = vld [vmem:[%s1773_s3 + $0x58] sm:$0xff]   ;;  %v26_v52 = vld [vmem:[%s1770_s0 + $0x20] sm:$0xff] }
  0x12   :  { %v27_v53 = vld [vmem:[%s1770_s0 + $0x28] sm:$0xff]  ;;  %v1330_v54 = vld [vmem:[%s1773_s3 + $0xd8] sm:$0xff]   ;;  %v1332_v57 = vld [vmem:[%s1773_s3 + $0x60] sm:$0xff]  }
  0x13   :  { %269 = vmatpush1.bf16.msra.mxu0 %v1296_v19  ;;  %382 = vmatpush1.bf16.msra.mxu1 %v1297_v20  ;;  %v1329_v55 = vld [vmem:[%s1773_s3 + $0x18] sm:$0xff]   ;;  %v1334_v58 = vld [vmem:[%s1773_s3 + $0xe0] sm:$0xff]   ;;  %v40_v59 = vpack.c.bf16 %v27_v53, %v26_v52  ;;  %v1336_v62 = vld [vmem:[%s1773_s3 + $0x68] sm:$0xff]  }
  0x14   :  { %270 = vmatprep.subr.bf16.mxu0 %v1298_v21  ;;  %383 = vmatprep.subr.bf16.mxu1 %v1300_v22  ;;  %v1331_v56 = vld [vmem:[%s1773_s3 + $0x98] sm:$0xff]   ;;  %v1333_v60 = vld [vmem:[%s1773_s3 + $0x20] sm:$0xff]   ;;  %v28_v63 = vld [vmem:[%s1770_s0 + $0x30] sm:$0xff] }
  0x15   :  { %v1335_v61 = vld [vmem:[%s1773_s3 + $0xa0] sm:$0xff]   ;;  %v1338_v0 = vld [vmem:[%s1773_s3 + $0xe8] sm:$0xff]   ;;  %v29_v1 = vld [vmem:[%s1770_s0 + $0x38] sm:$0xff] }
  0x16   :  { %v1337_v3 = vld [vmem:[%s1773_s3 + $0x28] sm:$0xff]   ;;  %v1340_v5 = vld [vmem:[%s1773_s3 + $0x70] sm:$0xff]   ;;  %v41_v7 = vpack.c.bf16 %v29_v1, %v28_v63 }
  0x17   :  { %271 = vmatpush1.bf16.msra.mxu0 %v1302_v23  ;;  %384 = vmatpush1.bf16.msra.mxu1 %v1303_v24  ;;  %v1339_v4 = vld [vmem:[%s1773_s3 + $0xa8] sm:$0xff]   ;;  %v1342_v6 = vld [vmem:[%s1773_s3 + $0xf0] sm:$0xff]  }
  0x18   :  { %272 = vmatprep.subr.bf16.mxu0 %v1304_v25  ;;  %385 = vmatprep.subr.bf16.mxu1 %v1306_v26  ;;  %v1341_v8 = vld [vmem:[%s1773_s3 + $0x30] sm:$0xff]  }
  0x19   :  { %v1343_v9 = vld [vmem:[%s1773_s3 + $0xb0] sm:$0xff]  }
  0x1b   :  { %273 = vmatpush1.bf16.msra.mxu0 %v1308_v27  ;;  %386 = vmatpush1.bf16.msra.mxu1 %v1309_v28 }
  0x1c   :  { %274 = vmatprep.subr.bf16.mxu0 %v1310_v29  ;;  %387 = vmatprep.subr.bf16.mxu1 %v1312_v30 }
  0x1f   :  { %275 = vmatpush1.bf16.msra.mxu0 %v1314_v31  ;;  %388 = vmatpush1.bf16.msra.mxu1 %v1315_v32 }
  0x20   :  { %1136 = vmatprep.subr.bf16.mxu0 %v1316_v35  ;;  %1200 = vmatprep.subr.bf16.mxu1 %v1318_v36 }
  0x22   :  { %293 = vmatmul.mubr.bf16.vlgmr.msra.gmra.mrb[0].mxu0 %v38_v37  ;;  %406 = vmatmul.mubr.bf16.vlgmr.msra.gmra.mrb[0].mxu1 %v38_v37 }
  0x23   :  { %302 = vmatprep.mubr.bf16.mxu0 %v1372_v2  ;;  %415 = vmatprep.mubr.bf16.mxu1 %v1372_v2 }
  0x24   :  { %1137 = vmatpush3.bf16.msra.mxu0 %v1317_v38  ;;  %1201 = vmatpush3.bf16.msra.mxu1 %v1319_v39 }
  0x25   :  { %1138 = vmatprep.subr.bf16.mxu0 %v1320_v40  ;;  %1202 = vmatprep.subr.bf16.mxu1 %v1322_v43 }
  0x28   :  { %1139 = vmatpush3.bf16.msra.mxu0 %v1321_v44  ;;  %1203 = vmatpush3.bf16.msra.mxu1 %v1323_v45 }
  0x29   :  { %1140 = vmatprep.subr.bf16.mxu0 %v1324_v46  ;;  %1204 = vmatprep.subr.bf16.mxu1 %v1326_v47 }
  0x2a   :  { %303 = vmatmul.mubr.bf16.gmra.mrb[4].mxu0 %v39_v48  ;;  %416 = vmatmul.mubr.bf16.gmra.mrb[4].mxu1 %v39_v48 }
  0x2b   :  { %312 = vmatprep.mubr.bf16.mxu0 %v1372_v2  ;;  %425 = vmatprep.mubr.bf16.mxu1 %v1372_v2 }
  0x2c   :  { %1141 = vmatpush3.bf16.msra.mxu0 %v1325_v49  ;;  %1205 = vmatpush3.bf16.msra.mxu1 %v1327_v50 }
  0x2d   :  { %1142 = vmatprep.subr.bf16.mxu0 %v1328_v51  ;;  %1206 = vmatprep.subr.bf16.mxu1 %v1330_v54 }
  0x30   :  { %1143 = vmatpush3.bf16.msra.mxu0 %v1329_v55  ;;  %1207 = vmatpush3.bf16.msra.mxu1 %v1331_v56 }
  0x31   :  { %1144 = vmatprep.subr.bf16.mxu0 %v1332_v57  ;;  %1208 = vmatprep.subr.bf16.mxu1 %v1334_v58 }
  0x32   :  { %313 = vmatmul.mubr.bf16.gmra.mrb[8].mxu0 %v40_v59  ;;  %426 = vmatmul.mubr.bf16.gmra.mrb[8].mxu1 %v40_v59 }
  0x33   :  { %322 = vmatprep.mubr.bf16.mxu0 %v1372_v2  ;;  %435 = vmatprep.mubr.bf16.mxu1 %v1372_v2 }
  0x34   :  { %1145 = vmatpush3.bf16.msra.mxu0 %v1333_v60  ;;  %1209 = vmatpush3.bf16.msra.mxu1 %v1335_v61 }
  0x35   :  { %1146 = vmatprep.subr.bf16.mxu0 %v1336_v62  ;;  %1210 = vmatprep.subr.bf16.mxu1 %v1338_v0 }
  0x38   :  { %1147 = vmatpush3.bf16.msra.mxu0 %v1337_v3  ;;  %1211 = vmatpush3.bf16.msra.mxu1 %v1339_v4 }
  0x39   :  { %10 = vsyncpa [#allocation3], 0  ;;  %1148 = vmatprep.subr.bf16.mxu0 %v1340_v5  ;;  %1212 = vmatprep.subr.bf16.mxu1 %v1342_v6  ;;  %v30_v10 = vld [vmem:[%s1770_s0 + $0x40] sm:$0xff]  ;;  %v31_v11 = vld [vmem:[%s1770_s0 + $0x48] sm:$0xff]  ;;  %v80_v25 = vlaneseq }
  0x3a   :  { %323 = vmatmul.mubr.bf16.gmra.mrb[12].mxu0 %v41_v7  ;;  %436 = vmatmul.mubr.bf16.gmra.mrb[12].mxu1 %v41_v7  ;;  %v42_v12 = vpack.c.bf16 %v31_v11, %v30_v10  ;;  %v32_v13 = vld [vmem:[%s1770_s0 + $0x50] sm:$0xff]  ;;  %v33_v14 = vld [vmem:[%s1770_s0 + $0x58] sm:$0xff]  ;;  %v34_v16 = vld [vmem:[%s1770_s0 + $0x60] sm:$0xff] }
  0x3b   :  { %332 = vmatprep.mubr.bf16.mxu0 %v1372_v2  ;;  %445 = vmatprep.mubr.bf16.mxu1 %v1372_v2  ;;  %v43_v15 = vpack.c.bf16 %v33_v14, %v32_v13  ;;  %v35_v17 = vld [vmem:[%s1770_s0 + $0x68] sm:$0xff]  ;;  %v36_v19 = vld [vmem:[%s1770_s0 + $0x70] sm:$0xff]  ;;  %v37_v20 = vld [vmem:[%s1770_s0 + $0x78] sm:$0xff]  ;;  %v81_v26 = vshrl.u32 %v80_v25, 7 }
  0x3c   :  { %1149 = vmatpush3.bf16.msra.mxu0 %v1341_v8  ;;  %1213 = vmatpush3.bf16.msra.mxu1 %v1343_v9  ;;  %v44_v18 = vpack.c.bf16 %v35_v17, %v34_v16  ;;  %v45_v21 = vpack.c.bf16 %v37_v20, %v36_v19  ;;  %v1344_v22 = vld [vmem:[%s1773_s3 + $0x78] sm:$0xff]   ;;  %v78_v29 = vld [vmem:[%s1772_s2] sm:$0xf] }
  0x3d   :  { %v1346_v23 = vld [vmem:[%s1773_s3 + $0xf8] sm:$0xff]   ;;  %1150 = vmatprep.subr.bf16.mxu0 %v1344_v22  ;;  %v82_v27 = vsub.s32 0, %v81_v26  ;;  %v90_v28 = vsub.s32 2, %v81_v26  ;;  %v86_v30 = vsub.s32 1, %v81_v26  ;;  %v94_v31 = vsub.s32 3, %v81_v26 }
  0x3e   :  { %v1347_v24 = vld [vmem:[%s1773_s3 + $0xb8] sm:$0xff]   ;;  %1214 = vmatprep.subr.bf16.mxu1 %v1346_v23 }
  0x3f   :  { %v1665_v32 = vrot.slane %v78_v29, %v82_v27  ;;  %v1667_v33 = vrot.slane %v78_v29, %v90_v28  ;;  %v1669_v34 = vrot.slane %v78_v29, %v86_v30  ;;  %v1671_v35 = vrot.slane %v78_v29, %v94_v31 }
  0x40   :  { %1215 = vmatpush3.bf16.msra.mxu1 %v1347_v24 }
  0x42   :  { %333 = vmatmul.mubr.bf16.gmra.mrb[16].mxu0 %v42_v12  ;;  %446 = vmatmul.mubr.bf16.gmra.mrb[16].mxu1 %v42_v12 }
  0x43   :  { %342 = vmatprep.mubr.bf16.mxu0 %v1372_v2  ;;  %455 = vmatprep.mubr.bf16.mxu1 %v1372_v2 }
  0x4a   :  { %343 = vmatmul.mubr.bf16.gmra.mrb[20].mxu0 %v43_v15  ;;  %456 = vmatmul.mubr.bf16.gmra.mrb[20].mxu1 %v43_v15 }
  0x4b   :  { %352 = vmatprep.mubr.bf16.mxu0 %v1372_v2  ;;  %465 = vmatprep.mubr.bf16.mxu1 %v1372_v2 }
  0x52   :  { %353 = vmatmul.mubr.bf16.gmra.mrb[24].mxu0 %v44_v18  ;;  %466 = vmatmul.mubr.bf16.gmra.mrb[24].mxu1 %v44_v18 }
  0x53   :  { %362 = vmatprep.mubr.bf16.mxu0 %v1372_v2  ;;  %475 = vmatprep.mubr.bf16.mxu1 %v1372_v2  ;;  %v1345_v2 = vld [vmem:[%s1773_s3 + $0x38] sm:$0xff]  }
  0x54   :  { %1151 = vmatpush3.bf16.msra.mxu0 %v1345_v2 }
  0x5a   :  { %363 = vmatmul.mubr.bf16.gmra.mrb[28].mxu0 %v45_v21  ;;  %476 = vmatmul.mubr.bf16.gmra.mrb[28].mxu1 %v45_v21 }
  0xf5   :  { %v294_v36 = vpop.f32.mrb[0].mxu0  ;;  %v407_v37 = vpop.f32.mrb[0].mxu1 }
  0xf6   :  { %v295_v38 = vadd.f32 %v294_v36, %v1665_v32  ;;  %v408_v39 = vadd.f32 %v407_v37, %v1667_v33  ;;  %v296_v40 = vpop.f32.mrb[1].mxu0  ;;  %v409_v41 = vpop.f32.mrb[1].mxu1 }
  0xf7   :  { %v297_v42 = vadd.f32 %v296_v40, %v1669_v34  ;;  %v410_v43 = vadd.f32 %v409_v41, %v1671_v35  ;;  %v298_v44 = vpop.f32.mrb[2].mxu0  ;;  %v411_v45 = vpop.f32.mrb[2].mxu1 }
  0xf8   :  { %v488_v46 = vmax.f32 %v408_v39, 0.0  ;;  %v299_v47 = vadd.f32 %v298_v44, %v1665_v32  ;;  %v412_v48 = vadd.f32 %v411_v45, %v1667_v33  ;;  %v300_v49 = vpop.f32.mrb[3].mxu0  ;;  %v413_v50 = vpop.f32.mrb[3].mxu1  ;;  %v486_v54 = vmax.f32 %v295_v38, 0.0 }
  0xf9   :  { %v489_v51 = vmax.f32 %v410_v43, 0.0  ;;  %v301_v52 = vadd.f32 %v300_v49, %v1669_v34  ;;  %v414_v53 = vadd.f32 %v413_v50, %v1671_v35  ;;  %v487_v57 = vmax.f32 %v297_v42, 0.0 }
  0xfa   :  { %v490_v55 = vmax.f32 %v299_v47, 0.0  ;;  %v492_v56 = vmax.f32 %v412_v48, 0.0 }
  0xfb   :  { %v491_v58 = vmax.f32 %v301_v52, 0.0  ;;  %v493_v59 = vmax.f32 %v414_v53, 0.0 }
  0xfc   :  { %v550_v60 = vpack.c.bf16 %v490_v55, %v486_v54  ;;  %v552_v61 = vpack.c.bf16 %v492_v56, %v488_v46 }
  0xfd   :  { %v551_v62 = vpack.c.bf16 %v491_v58, %v487_v57  ;;  %v553_v63 = vpack.c.bf16 %v493_v59, %v489_v51  ;;  %v304_v0 = vpop.f32.mrb[4].mxu0  ;;  %v417_v1 = vpop.f32.mrb[4].mxu1 }
  0xfe   :  { %v305_v3 = vadd.f32 %v304_v0, %v1665_v32  ;;  %v418_v4 = vadd.f32 %v417_v1, %v1667_v33  ;;  %v306_v5 = vpop.f32.mrb[5].mxu0  ;;  %v419_v6 = vpop.f32.mrb[5].mxu1 }
  0xff   :  { %v307_v7 = vadd.f32 %v306_v5, %v1669_v34  ;;  %v420_v8 = vadd.f32 %v419_v6, %v1671_v35  ;;  %v308_v9 = vpop.f32.mrb[6].mxu0  ;;  %v421_v10 = vpop.f32.mrb[6].mxu1  ;;  %877 = vmatprep.mubr.bf16.mxu0 %v551_v62  ;;  %974 = vmatprep.mubr.bf16.mxu1 %v553_v63 }
 0x100   :  { %v496_v11 = vmax.f32 %v418_v4, 0.0  ;;  %v309_v12 = vadd.f32 %v308_v9, %v1665_v32  ;;  %v422_v13 = vadd.f32 %v421_v10, %v1667_v33  ;;  %v310_v14 = vpop.f32.mrb[7].mxu0  ;;  %v423_v15 = vpop.f32.mrb[7].mxu1  ;;  %878 = vmatmul.mubr.bf16.vlgmr.msra.gmra.mrb[32].mxu0 %v550_v60  ;;  %975 = vmatmul.mubr.bf16.vlgmr.msra.gmra.mrb[32].mxu1 %v552_v61  ;;  %v494_v19 = vmax.f32 %v305_v3, 0.0 }
 0x101   :  { %v497_v16 = vmax.f32 %v420_v8, 0.0  ;;  %v311_v17 = vadd.f32 %v310_v14, %v1669_v34  ;;  %v424_v18 = vadd.f32 %v423_v15, %v1671_v35  ;;  %v495_v22 = vmax.f32 %v307_v7, 0.0 }
 0x102   :  { %v498_v20 = vmax.f32 %v309_v12, 0.0  ;;  %v500_v21 = vmax.f32 %v422_v13, 0.0 }
 0x103   :  { %v499_v23 = vmax.f32 %v311_v17, 0.0  ;;  %v501_v2 = vmax.f32 %v424_v18, 0.0 }
 0x104   :  { %v554_v24 = vpack.c.bf16 %v498_v20, %v494_v19  ;;  %v556_v25 = vpack.c.bf16 %v500_v21, %v496_v11 }
 0x105   :  { %v555_v26 = vpack.c.bf16 %v499_v23, %v495_v22  ;;  %v557_v27 = vpack.c.bf16 %v501_v2, %v497_v16  ;;  %v314_v28 = vpop.f32.mrb[8].mxu0  ;;  %v427_v29 = vpop.f32.mrb[8].mxu1 }
 0x106   :  { %v315_v30 = vadd.f32 %v314_v28, %v1665_v32  ;;  %v428_v31 = vadd.f32 %v427_v29, %v1667_v33  ;;  %v316_v36 = vpop.f32.mrb[9].mxu0  ;;  %v429_v37 = vpop.f32.mrb[9].mxu1 }
 0x107   :  { %v317_v38 = vadd.f32 %v316_v36, %v1669_v34  ;;  %v430_v39 = vadd.f32 %v429_v37, %v1671_v35  ;;  %v318_v40 = vpop.f32.mrb[10].mxu0  ;;  %v431_v41 = vpop.f32.mrb[10].mxu1  ;;  %885 = vmatprep.mubr.bf16.mxu0 %v555_v26  ;;  %982 = vmatprep.mubr.bf16.mxu1 %v557_v27 }
 0x108   :  { %v504_v42 = vmax.f32 %v428_v31, 0.0  ;;  %v319_v43 = vadd.f32 %v318_v40, %v1665_v32  ;;  %v432_v44 = vadd.f32 %v431_v41, %v1667_v33  ;;  %v320_v45 = vpop.f32.mrb[11].mxu0  ;;  %v433_v46 = vpop.f32.mrb[11].mxu1  ;;  %886 = vmatmul.mubr.bf16.gmra.mrb[36].mxu0 %v554_v24  ;;  %983 = vmatmul.mubr.bf16.gmra.mrb[36].mxu1 %v556_v25  ;;  %v502_v50 = vmax.f32 %v315_v30, 0.0 }
 0x109   :  { %v505_v47 = vmax.f32 %v430_v39, 0.0  ;;  %v321_v48 = vadd.f32 %v320_v45, %v1669_v34  ;;  %v434_v49 = vadd.f32 %v433_v46, %v1671_v35  ;;  %v503_v53 = vmax.f32 %v317_v38, 0.0 }
 0x10a   :  { %v506_v51 = vmax.f32 %v319_v43, 0.0  ;;  %v508_v52 = vmax.f32 %v432_v44, 0.0 }
 0x10b   :  { %v507_v54 = vmax.f32 %v321_v48, 0.0  ;;  %v509_v55 = vmax.f32 %v434_v49, 0.0 }
 0x10c   :  { %v558_v56 = vpack.c.bf16 %v506_v51, %v502_v50  ;;  %v560_v57 = vpack.c.bf16 %v508_v52, %v504_v42 }
 0x10d   :  { %v559_v58 = vpack.c.bf16 %v507_v54, %v503_v53  ;;  %v561_v59 = vpack.c.bf16 %v509_v55, %v505_v47  ;;  %v324_v60 = vpop.f32.mrb[12].mxu0  ;;  %v437_v61 = vpop.f32.mrb[12].mxu1 }
 0x10e   :  { %v325_v62 = vadd.f32 %v324_v60, %v1665_v32  ;;  %v438_v63 = vadd.f32 %v437_v61, %v1667_v33  ;;  %v326_v0 = vpop.f32.mrb[13].mxu0  ;;  %v439_v1 = vpop.f32.mrb[13].mxu1 }
 0x10f   :  { %v327_v3 = vadd.f32 %v326_v0, %v1669_v34  ;;  %v440_v4 = vadd.f32 %v439_v1, %v1671_v35  ;;  %v328_v5 = vpop.f32.mrb[14].mxu0  ;;  %v441_v6 = vpop.f32.mrb[14].mxu1  ;;  %893 = vmatprep.mubr.bf16.mxu0 %v559_v58  ;;  %990 = vmatprep.mubr.bf16.mxu1 %v561_v59 }
 0x110   :  { %v512_v7 = vmax.f32 %v438_v63, 0.0  ;;  %v329_v8 = vadd.f32 %v328_v5, %v1665_v32  ;;  %v442_v9 = vadd.f32 %v441_v6, %v1667_v33  ;;  %v330_v10 = vpop.f32.mrb[15].mxu0  ;;  %v443_v11 = vpop.f32.mrb[15].mxu1  ;;  %894 = vmatmul.mubr.bf16.gmra.mrb[40].mxu0 %v558_v56  ;;  %991 = vmatmul.mubr.bf16.gmra.mrb[40].mxu1 %v560_v57  ;;  %v510_v15 = vmax.f32 %v325_v62, 0.0 }
 0x111   :  { %v513_v12 = vmax.f32 %v440_v4, 0.0  ;;  %v331_v13 = vadd.f32 %v330_v10, %v1669_v34  ;;  %v444_v14 = vadd.f32 %v443_v11, %v1671_v35  ;;  %v511_v18 = vmax.f32 %v327_v3, 0.0 }
 0x112   :  { %v514_v16 = vmax.f32 %v329_v8, 0.0  ;;  %v516_v17 = vmax.f32 %v442_v9, 0.0 }
 0x113   :  { %v515_v19 = vmax.f32 %v331_v13, 0.0  ;;  %v517_v20 = vmax.f32 %v444_v14, 0.0 }
 0x114   :  { %v562_v21 = vpack.c.bf16 %v514_v16, %v510_v15  ;;  %v564_v22 = vpack.c.bf16 %v516_v17, %v512_v7 }
 0x115   :  { %v563_v23 = vpack.c.bf16 %v515_v19, %v511_v18  ;;  %v565_v2 = vpack.c.bf16 %v517_v20, %v513_v12  ;;  %v334_v24 = vpop.f32.mrb[16].mxu0  ;;  %v447_v25 = vpop.f32.mrb[16].mxu1 }
 0x116   :  { %v335_v26 = vadd.f32 %v334_v24, %v1665_v32  ;;  %v448_v27 = vadd.f32 %v447_v25, %v1667_v33  ;;  %v336_v28 = vpop.f32.mrb[17].mxu0  ;;  %v449_v29 = vpop.f32.mrb[17].mxu1 }
 0x117   :  { %v337_v30 = vadd.f32 %v336_v28, %v1669_v34  ;;  %v450_v31 = vadd.f32 %v449_v29, %v1671_v35  ;;  %v338_v36 = vpop.f32.mrb[18].mxu0  ;;  %v451_v37 = vpop.f32.mrb[18].mxu1  ;;  %901 = vmatprep.mubr.bf16.mxu0 %v563_v23  ;;  %998 = vmatprep.mubr.bf16.mxu1 %v565_v2 }
 0x118   :  { %v520_v38 = vmax.f32 %v448_v27, 0.0  ;;  %v339_v39 = vadd.f32 %v338_v36, %v1665_v32  ;;  %v452_v40 = vadd.f32 %v451_v37, %v1667_v33  ;;  %v340_v41 = vpop.f32.mrb[19].mxu0  ;;  %v453_v42 = vpop.f32.mrb[19].mxu1  ;;  %902 = vmatmul.mubr.bf16.gmra.mrb[44].mxu0 %v562_v21  ;;  %999 = vmatmul.mubr.bf16.gmra.mrb[44].mxu1 %v564_v22  ;;  %v518_v46 = vmax.f32 %v335_v26, 0.0 }
 0x119   :  { %v521_v43 = vmax.f32 %v450_v31, 0.0  ;;  %v341_v44 = vadd.f32 %v340_v41, %v1669_v34  ;;  %v454_v45 = vadd.f32 %v453_v42, %v1671_v35  ;;  %v519_v49 = vmax.f32 %v337_v30, 0.0 }
 0x11a   :  { %v522_v47 = vmax.f32 %v339_v39, 0.0  ;;  %v524_v48 = vmax.f32 %v452_v40, 0.0 }
 0x11b   :  { %v523_v50 = vmax.f32 %v341_v44, 0.0  ;;  %v525_v51 = vmax.f32 %v454_v45, 0.0 }
 0x11c   :  { %v566_v52 = vpack.c.bf16 %v522_v47, %v518_v46  ;;  %v568_v53 = vpack.c.bf16 %v524_v48, %v520_v38 }
 0x11d   :  { %v567_v54 = vpack.c.bf16 %v523_v50, %v519_v49  ;;  %v569_v55 = vpack.c.bf16 %v525_v51, %v521_v43  ;;  %v344_v56 = vpop.f32.mrb[20].mxu0  ;;  %v457_v57 = vpop.f32.mrb[20].mxu1 }
 0x11e   :  { %v345_v58 = vadd.f32 %v344_v56, %v1665_v32  ;;  %v458_v59 = vadd.f32 %v457_v57, %v1667_v33  ;;  %v346_v60 = vpop.f32.mrb[21].mxu0  ;;  %v459_v61 = vpop.f32.mrb[21].mxu1 }
 0x11f   :  { %v347_v62 = vadd.f32 %v346_v60, %v1669_v34  ;;  %v460_v63 = vadd.f32 %v459_v61, %v1671_v35  ;;  %v348_v0 = vpop.f32.mrb[22].mxu0  ;;  %v461_v1 = vpop.f32.mrb[22].mxu1  ;;  %909 = vmatprep.mubr.bf16.mxu0 %v567_v54  ;;  %1006 = vmatprep.mubr.bf16.mxu1 %v569_v55 }
 0x120   :  { %v528_v3 = vmax.f32 %v458_v59, 0.0  ;;  %v349_v4 = vadd.f32 %v348_v0, %v1665_v32  ;;  %v462_v5 = vadd.f32 %v461_v1, %v1667_v33  ;;  %v350_v6 = vpop.f32.mrb[23].mxu0  ;;  %v463_v7 = vpop.f32.mrb[23].mxu1  ;;  %910 = vmatmul.mubr.bf16.gmra.mrb[48].mxu0 %v566_v52  ;;  %1007 = vmatmul.mubr.bf16.gmra.mrb[48].mxu1 %v568_v53  ;;  %v526_v11 = vmax.f32 %v345_v58, 0.0 }
 0x121   :  { %v529_v8 = vmax.f32 %v460_v63, 0.0  ;;  %v351_v9 = vadd.f32 %v350_v6, %v1669_v34  ;;  %v464_v10 = vadd.f32 %v463_v7, %v1671_v35  ;;  %v527_v14 = vmax.f32 %v347_v62, 0.0 }
 0x122   :  { %v530_v12 = vmax.f32 %v349_v4, 0.0  ;;  %v532_v13 = vmax.f32 %v462_v5, 0.0 }
 0x123   :  { %v531_v15 = vmax.f32 %v351_v9, 0.0  ;;  %v533_v16 = vmax.f32 %v464_v10, 0.0 }
 0x124   :  { %v570_v17 = vpack.c.bf16 %v530_v12, %v526_v11  ;;  %v572_v18 = vpack.c.bf16 %v532_v13, %v528_v3 }
 0x125   :  { %v571_v19 = vpack.c.bf16 %v531_v15, %v527_v14  ;;  %v573_v20 = vpack.c.bf16 %v533_v16, %v529_v8  ;;  %v354_v21 = vpop.f32.mrb[24].mxu0  ;;  %v467_v22 = vpop.f32.mrb[24].mxu1 }
 0x126   :  { %v355_v23 = vadd.f32 %v354_v21, %v1665_v32  ;;  %v468_v2 = vadd.f32 %v467_v22, %v1667_v33  ;;  %v356_v24 = vpop.f32.mrb[25].mxu0  ;;  %v469_v25 = vpop.f32.mrb[25].mxu1 }
 0x127   :  { %v357_v26 = vadd.f32 %v356_v24, %v1669_v34  ;;  %v470_v27 = vadd.f32 %v469_v25, %v1671_v35  ;;  %v358_v28 = vpop.f32.mrb[26].mxu0  ;;  %v471_v29 = vpop.f32.mrb[26].mxu1  ;;  %917 = vmatprep.mubr.bf16.mxu0 %v571_v19  ;;  %1014 = vmatprep.mubr.bf16.mxu1 %v573_v20 }
 0x128   :  { %v536_v30 = vmax.f32 %v468_v2, 0.0  ;;  %v359_v31 = vadd.f32 %v358_v28, %v1665_v32  ;;  %v472_v36 = vadd.f32 %v471_v29, %v1667_v33  ;;  %v360_v37 = vpop.f32.mrb[27].mxu0  ;;  %v473_v38 = vpop.f32.mrb[27].mxu1  ;;  %918 = vmatmul.mubr.bf16.gmra.mrb[52].mxu0 %v570_v17  ;;  %1015 = vmatmul.mubr.bf16.gmra.mrb[52].mxu1 %v572_v18  ;;  %v534_v42 = vmax.f32 %v355_v23, 0.0 }
 0x129   :  { %v537_v39 = vmax.f32 %v470_v27, 0.0  ;;  %v361_v40 = vadd.f32 %v360_v37, %v1669_v34  ;;  %v474_v41 = vadd.f32 %v473_v38, %v1671_v35  ;;  %v535_v45 = vmax.f32 %v357_v26, 0.0 }
 0x12a   :  { %v538_v43 = vmax.f32 %v359_v31, 0.0  ;;  %v540_v44 = vmax.f32 %v472_v36, 0.0 }
 0x12b   :  { %v539_v46 = vmax.f32 %v361_v40, 0.0  ;;  %v541_v47 = vmax.f32 %v474_v41, 0.0 }
 0x12c   :  { %v574_v48 = vpack.c.bf16 %v538_v43, %v534_v42  ;;  %v576_v49 = vpack.c.bf16 %v540_v44, %v536_v30 }
 0x12d   :  { %v575_v50 = vpack.c.bf16 %v539_v46, %v535_v45  ;;  %v577_v51 = vpack.c.bf16 %v541_v47, %v537_v39  ;;  %v364_v52 = vpop.f32.mrb[28].mxu0  ;;  %v477_v53 = vpop.f32.mrb[28].mxu1 }
 0x12e   :  { %v365_v54 = vadd.f32 %v364_v52, %v1665_v32  ;;  %v478_v55 = vadd.f32 %v477_v53, %v1667_v33  ;;  %v366_v56 = vpop.f32.mrb[29].mxu0  ;;  %v479_v57 = vpop.f32.mrb[29].mxu1 }
 0x12f   :  { %v367_v58 = vadd.f32 %v366_v56, %v1669_v34  ;;  %v480_v59 = vadd.f32 %v479_v57, %v1671_v35  ;;  %v368_v60 = vpop.f32.mrb[30].mxu0  ;;  %v481_v61 = vpop.f32.mrb[30].mxu1  ;;  %925 = vmatprep.mubr.bf16.mxu0 %v575_v50  ;;  %1022 = vmatprep.mubr.bf16.mxu1 %v577_v51 }
 0x130   :  { %v544_v62 = vmax.f32 %v478_v55, 0.0  ;;  %v369_v63 = vadd.f32 %v368_v60, %v1665_v32  ;;  %v482_v0 = vadd.f32 %v481_v61, %v1667_v33  ;;  %v370_v1 = vpop.f32.mrb[31].mxu0  ;;  %v483_v3 = vpop.f32.mrb[31].mxu1  ;;  %926 = vmatmul.mubr.bf16.gmra.mrb[56].mxu0 %v574_v48  ;;  %1023 = vmatmul.mubr.bf16.gmra.mrb[56].mxu1 %v576_v49  ;;  %v542_v7 = vmax.f32 %v365_v54, 0.0 }
 0x131   :  { %v545_v4 = vmax.f32 %v480_v59, 0.0  ;;  %v371_v5 = vadd.f32 %v370_v1, %v1669_v34  ;;  %v484_v6 = vadd.f32 %v483_v3, %v1671_v35  ;;  %v543_v10 = vmax.f32 %v367_v58, 0.0  ;;  %v1740_v34 = vld [vmem:[%s1774_s4] ss:$0 sm:$0xff]  ;;  %s1373_s4 = smov [#allocation2]  }
 0x132   :  { %v546_v8 = vmax.f32 %v369_v63, 0.0  ;;  %v548_v9 = vmax.f32 %v482_v0, 0.0  ;;  %s1060_s25 = sshll.u32 %s1373_s4, 4  ;;  %s1061_s25 = int_to_ptr.vmem [resolvable:$true] %s1060_s25 }
 0x133   :  { %v547_v11 = vmax.f32 %v371_v5, 0.0  ;;  %v549_v12 = vmax.f32 %v484_v6, 0.0  ;;  %s1348_s26 = scalar_lea.vmem %s1061_s25, 2048  ;;  %p1353_p1 = scmp.lt.s32.totalorder %s1061_s25, %s1061_s25 }
 0x134   :  { %v578_v13 = vpack.c.bf16 %v546_v8, %v542_v7  ;;  %v580_v14 = vpack.c.bf16 %v548_v9, %v544_v62  ;;  %p1349_p0 = scmp.ne.s32.totalorder %s1061_s25, %s1348_s26  ;;  %p1354_p2 = scmp.lt.s32.totalorder %s1348_s26, %s1348_s26 }
 0x135   :  { %v579_v32 = vpack.c.bf16 %v547_v11, %v543_v10  ;;  %v581_v15 = vpack.c.bf16 %v549_v12, %v545_v4 }
 0x136   :  { %p1355_p3 = por %p1354_p2, %p1353_p1 }
 0x137   :  { %933 = vmatprep.mubr.bf16.mxu0 %v579_v32  ;;  %1030 = vmatprep.mubr.bf16.mxu1 %v581_v15 }
 0x138   :  { %934 = vmatmul.mubr.bf16.gmra.mrb[60].mxu0 %v578_v13  ;;  %1031 = vmatmul.mubr.bf16.gmra.mrb[60].mxu1 %v580_v14  ;;  %p1356_p4 = pnand %p1355_p3, %p1349_p0 }
 0x1d3   :  { %v1152_v33 = vpop.f32.mrb[32].mxu0  ;;  %v1216_v16 = vpop.f32.mrb[32].mxu1 }
 0x1d4   :  { %v1153_v35 = vpop.f32.mrb[33].mxu0  ;;  %v1217_v17 = vpop.f32.mrb[33].mxu1 }
 0x1d5   :  { %v1154_v18 = vadd.f32 %v1153_v35, %v1152_v33  ;;  %v1218_v19 = vadd.f32 %v1217_v17, %v1216_v16  ;;  %v1155_v20 = vpop.f32.mrb[34].mxu0  ;;  %v1219_v21 = vpop.f32.mrb[34].mxu1 }
 0x1d6   :  { %v1156_v22 = vpop.f32.mrb[35].mxu0  ;;  %v1220_v23 = vpop.f32.mrb[35].mxu1 }
 0x1d7   :  { %v880_v2 = vadd.f32 %v1154_v18, %v1740_v34  ;;  %v1157_v24 = vadd.f32 %v1156_v22, %v1155_v20  ;;  %v1221_v25 = vadd.f32 %v1220_v23, %v1219_v21 }
 0x1d9   :  { %v977_v26 = vadd.f32 %v1218_v19, %v880_v2  ;;  %v883_v27 = vadd.f32 %v1157_v24, %v1740_v34 }
 0x1db   :  { %1039 = vst [vmem:[#allocation2] sm:$0xff] %v977_v26  ;;  %v980_v28 = vadd.f32 %v1221_v25, %v883_v27  ;;  %v1158_v29 = vpop.f32.mrb[36].mxu0  ;;  %v1222_v30 = vpop.f32.mrb[36].mxu1 }
 0x1dc   :  { %v1159_v31 = vpop.f32.mrb[37].mxu0  ;;  %v1223_v36 = vpop.f32.mrb[37].mxu1 }
 0x1dd   :  { %1040 = vst [vmem:[#allocation2 + $0x8] sm:$0xff] %v980_v28  ;;  %v1160_v37 = vadd.f32 %v1159_v31, %v1158_v29  ;;  %v1224_v38 = vadd.f32 %v1223_v36, %v1222_v30  ;;  %v1161_v39 = vpop.f32.mrb[38].mxu0  ;;  %v1225_v40 = vpop.f32.mrb[38].mxu1 }
 0x1de   :  { %v1162_v41 = vpop.f32.mrb[39].mxu0  ;;  %v1226_v42 = vpop.f32.mrb[39].mxu1 }
 0x1df   :  { %v888_v43 = vadd.f32 %v1160_v37, %v1740_v34  ;;  %v1163_v44 = vadd.f32 %v1162_v41, %v1161_v39  ;;  %v1227_v45 = vadd.f32 %v1226_v42, %v1225_v40 }
 0x1e1   :  { %v985_v46 = vadd.f32 %v1224_v38, %v888_v43  ;;  %v891_v47 = vadd.f32 %v1163_v44, %v1740_v34 }
 0x1e3   :  { %1041 = vst [vmem:[#allocation2 + $0x10] sm:$0xff] %v985_v46  ;;  %v988_v48 = vadd.f32 %v1227_v45, %v891_v47  ;;  %v1164_v49 = vpop.f32.mrb[40].mxu0  ;;  %v1228_v50 = vpop.f32.mrb[40].mxu1 }
 0x1e4   :  { %v1165_v51 = vpop.f32.mrb[41].mxu0  ;;  %v1229_v52 = vpop.f32.mrb[41].mxu1 }
 0x1e5   :  { %1042 = vst [vmem:[#allocation2 + $0x18] sm:$0xff] %v988_v48  ;;  %v1166_v53 = vadd.f32 %v1165_v51, %v1164_v49  ;;  %v1230_v54 = vadd.f32 %v1229_v52, %v1228_v50  ;;  %v1167_v55 = vpop.f32.mrb[42].mxu0  ;;  %v1231_v56 = vpop.f32.mrb[42].mxu1 }
 0x1e6   :  { %v1168_v57 = vpop.f32.mrb[43].mxu0  ;;  %v1232_v58 = vpop.f32.mrb[43].mxu1 }
 0x1e7   :  { %v896_v59 = vadd.f32 %v1166_v53, %v1740_v34  ;;  %v1169_v60 = vadd.f32 %v1168_v57, %v1167_v55  ;;  %v1233_v61 = vadd.f32 %v1232_v58, %v1231_v56 }
 0x1e9   :  { %v993_v62 = vadd.f32 %v1230_v54, %v896_v59  ;;  %v899_v63 = vadd.f32 %v1169_v60, %v1740_v34 }
 0x1eb   :  { %1043 = vst [vmem:[#allocation2 + $0x20] sm:$0xff] %v993_v62  ;;  %v996_v0 = vadd.f32 %v1233_v61, %v899_v63  ;;  %v1170_v1 = vpop.f32.mrb[44].mxu0  ;;  %v1234_v3 = vpop.f32.mrb[44].mxu1 }
 0x1ec   :  { %v1171_v4 = vpop.f32.mrb[45].mxu0  ;;  %v1235_v5 = vpop.f32.mrb[45].mxu1 }
 0x1ed   :  { %1044 = vst [vmem:[#allocation2 + $0x28] sm:$0xff] %v996_v0  ;;  %v1172_v6 = vadd.f32 %v1171_v4, %v1170_v1  ;;  %v1236_v7 = vadd.f32 %v1235_v5, %v1234_v3  ;;  %v1173_v8 = vpop.f32.mrb[46].mxu0  ;;  %v1237_v9 = vpop.f32.mrb[46].mxu1 }
 0x1ee   :  { %v1174_v10 = vpop.f32.mrb[47].mxu0  ;;  %v1238_v11 = vpop.f32.mrb[47].mxu1 }
 0x1ef   :  { %v904_v12 = vadd.f32 %v1172_v6, %v1740_v34  ;;  %v1175_v13 = vadd.f32 %v1174_v10, %v1173_v8  ;;  %v1239_v14 = vadd.f32 %v1238_v11, %v1237_v9 }
 0x1f1   :  { %v1001_v32 = vadd.f32 %v1236_v7, %v904_v12  ;;  %v907_v15 = vadd.f32 %v1175_v13, %v1740_v34 }
 0x1f3   :  { %1045 = vst [vmem:[#allocation2 + $0x30] sm:$0xff] %v1001_v32  ;;  %v1004_v33 = vadd.f32 %v1239_v14, %v907_v15  ;;  %v1176_v16 = vpop.f32.mrb[48].mxu0  ;;  %v1240_v35 = vpop.f32.mrb[48].mxu1 }
 0x1f4   :  { %v1177_v17 = vpop.f32.mrb[49].mxu0  ;;  %v1241_v18 = vpop.f32.mrb[49].mxu1 }
 0x1f5   :  { %1046 = vst [vmem:[#allocation2 + $0x38] sm:$0xff] %v1004_v33  ;;  %v1178_v19 = vadd.f32 %v1177_v17, %v1176_v16  ;;  %v1242_v20 = vadd.f32 %v1241_v18, %v1240_v35  ;;  %v1179_v21 = vpop.f32.mrb[50].mxu0  ;;  %v1243_v22 = vpop.f32.mrb[50].mxu1 }
 0x1f6   :  { %v1180_v23 = vpop.f32.mrb[51].mxu0  ;;  %v1244_v2 = vpop.f32.mrb[51].mxu1 }
 0x1f7   :  { %v912_v24 = vadd.f32 %v1178_v19, %v1740_v34  ;;  %v1181_v25 = vadd.f32 %v1180_v23, %v1179_v21  ;;  %v1245_v26 = vadd.f32 %v1244_v2, %v1243_v22 }
 0x1f9   :  { %v1009_v27 = vadd.f32 %v1242_v20, %v912_v24  ;;  %v915_v28 = vadd.f32 %v1181_v25, %v1740_v34 }
 0x1fb   :  { %1047 = vst [vmem:[#allocation2 + $0x40] sm:$0xff] %v1009_v27  ;;  %v1012_v29 = vadd.f32 %v1245_v26, %v915_v28  ;;  %v1182_v30 = vpop.f32.mrb[52].mxu0  ;;  %v1246_v31 = vpop.f32.mrb[52].mxu1 }
 0x1fc   :  { %v1183_v36 = vpop.f32.mrb[53].mxu0  ;;  %v1247_v37 = vpop.f32.mrb[53].mxu1 }
 0x1fd   :  { %1048 = vst [vmem:[#allocation2 + $0x48] sm:$0xff] %v1012_v29  ;;  %v1184_v38 = vadd.f32 %v1183_v36, %v1182_v30  ;;  %v1248_v39 = vadd.f32 %v1247_v37, %v1246_v31  ;;  %v1185_v40 = vpop.f32.mrb[54].mxu0  ;;  %v1249_v41 = vpop.f32.mrb[54].mxu1 }
 0x1fe   :  { %v1186_v42 = vpop.f32.mrb[55].mxu0  ;;  %v1250_v43 = vpop.f32.mrb[55].mxu1 }
 0x1ff   :  { %v920_v44 = vadd.f32 %v1184_v38, %v1740_v34  ;;  %v1187_v45 = vadd.f32 %v1186_v42, %v1185_v40  ;;  %v1251_v46 = vadd.f32 %v1250_v43, %v1249_v41 }
 0x201   :  { %v1017_v47 = vadd.f32 %v1248_v39, %v920_v44  ;;  %v923_v48 = vadd.f32 %v1187_v45, %v1740_v34 }
 0x203   :  { %1049 = vst [vmem:[#allocation2 + $0x50] sm:$0xff] %v1017_v47  ;;  %v1020_v49 = vadd.f32 %v1251_v46, %v923_v48  ;;  %v1188_v50 = vpop.f32.mrb[56].mxu0  ;;  %v1252_v51 = vpop.f32.mrb[56].mxu1 }
 0x204   :  { %v1189_v52 = vpop.f32.mrb[57].mxu0  ;;  %v1253_v53 = vpop.f32.mrb[57].mxu1 }
 0x205   :  { %1050 = vst [vmem:[#allocation2 + $0x58] sm:$0xff] %v1020_v49  ;;  %v1190_v54 = vadd.f32 %v1189_v52, %v1188_v50  ;;  %v1254_v55 = vadd.f32 %v1253_v53, %v1252_v51  ;;  %v1191_v56 = vpop.f32.mrb[58].mxu0  ;;  %v1255_v57 = vpop.f32.mrb[58].mxu1 }
 0x206   :  { %v1192_v58 = vpop.f32.mrb[59].mxu0  ;;  %v1256_v59 = vpop.f32.mrb[59].mxu1 }
 0x207   :  { %v928_v60 = vadd.f32 %v1190_v54, %v1740_v34  ;;  %v1193_v61 = vadd.f32 %v1192_v58, %v1191_v56  ;;  %v1257_v62 = vadd.f32 %v1256_v59, %v1255_v57 }
 0x209   :  { %v1025_v63 = vadd.f32 %v1254_v55, %v928_v60  ;;  %v931_v0 = vadd.f32 %v1193_v61, %v1740_v34 }
 0x20b   :  { %1051 = vst [vmem:[#allocation2 + $0x60] sm:$0xff] %v1025_v63  ;;  %v1028_v1 = vadd.f32 %v1257_v62, %v931_v0  ;;  %v1194_v3 = vpop.f32.mrb[60].mxu0  ;;  %v1258_v4 = vpop.f32.mrb[60].mxu1 }
 0x20c   :  { %v1195_v5 = vpop.f32.mrb[61].mxu0  ;;  %v1259_v6 = vpop.f32.mrb[61].mxu1 }
 0x20d   :  { %1052 = vst [vmem:[#allocation2 + $0x68] sm:$0xff] %v1028_v1  ;;  %v1196_v7 = vadd.f32 %v1195_v5, %v1194_v3  ;;  %v1260_v8 = vadd.f32 %v1259_v6, %v1258_v4  ;;  %v1197_v9 = vpop.f32.mrb[62].mxu0  ;;  %v1261_v10 = vpop.f32.mrb[62].mxu1 }
 0x20e   :  { %v1198_v11 = vpop.f32.mrb[63].mxu0  ;;  %v1262_v12 = vpop.f32.mrb[63].mxu1 }
 0x20f   :  { %v936_v13 = vadd.f32 %v1196_v7, %v1740_v34  ;;  %v1199_v14 = vadd.f32 %v1198_v11, %v1197_v9  ;;  %v1263_v32 = vadd.f32 %v1262_v12, %v1261_v10 }
 0x211   :  { %v1033_v15 = vadd.f32 %v1260_v8, %v936_v13  ;;  %v939_v33 = vadd.f32 %v1199_v14, %v1740_v34 }
 0x213   :  { %1053 = vst [vmem:[#allocation2 + $0x70] sm:$0xff] %v1033_v15  ;;  %v1036_v16 = vadd.f32 %v1263_v32, %v939_v33 }
 0x215   :  { %1054 = vst [vmem:[#allocation2 + $0x78] sm:$0xff] %v1036_v16 }
 0x216   :  { %1359 = shalt.err (!%p1356_p4)
}
 0x217   :  { %s1360_s29 = scalar_lea.hbm %s1775_s5, 2048 }
 0x218   :  { %p1361_p5 = scmp.ne.s32.totalorder %s1775_s5, %s1360_s29  ;;  %p1364_p6 = scmp.lt.u32.totalorder %s1360_s29, %s1775_s5 }
 0x21a   :  { %p1366_p7 = pnand %p1364_p6, %p1361_p5 }
 0x21c   :  { %1369 = shalt.err (!%p1366_p7)
}
 0x21d   :  { %s1374_s9 = smov 128   ;;  %s1375_s10 = smov 8  }
 0x21e   :  { %1066 = dma.vmem_to_hbm [thread:$0]  %s1061_s25, 2048, %s1775_s5, [#allocation3], %s1374_s9, %s1374_s9, %s1375_s10  }
 0x21f   :  { %1370 = dma.done.wait [#allocation3], 2048  }
 0x220   :  { %1371 = vsyncadd [#allocation3], 4294965248 }
 0x221   :  { %1070 = vsyncpa [#allocation3], 1 }

</bundles_post_ra>
